<compile_context>
chip_gen: v7x
topology: tpu7x:2x2x1
jax: 0.10.0
libtpu: 0.0.40
codegen_flags: <defaults>
</compile_context>

<pallas_src>
import jax
import jax.numpy as jnp
from jax.experimental import pallas as pl
from jax.experimental.pallas import tpu as pltpu


def _round_up(v, m):
    return ((v + m - 1) // m) * m


def _normalize_kernel(x_ref, sb_ref, o_ref):
    # x_ref:  (TB, LANE_P)  batch-row tile, lane axis = padded C*H*W
    # sb_ref: (2, LANE_P)   resident rows: [0] = 1/std, [1] = -mean/std (fp32)
    # o_ref:  (TB, LANE_P)
    x = x_ref[...].astype(jnp.float32)
    scale = sb_ref[0:1, :]
    bias = sb_ref[1:2, :]
    o_ref[...] = (x * scale + bias).astype(o_ref.dtype)


def normalize(x, mean, std, *, row_block=None, out_dtype=None, donate_input=False):
    """(x - mean) / std with per-channel mean/std, NCHW input (C == len(mean))."""
    N, C, H, W = x.shape
    assert mean.shape == (C,) and std.shape == (C,)
    HW = H * W
    LANE = C * HW
    LANE_P = _round_up(LANE, 128)  # lane axis padded to a multiple of 128
    pad = LANE_P - LANE

    if out_dtype is None:
        out_dtype = x.dtype

    # ---- resident scale/bias rows (fp32 for precision, broadcast not repeat) ----
    inv_std = (1.0 / std.astype(jnp.float32))                              # (C,)
    scale_row = jnp.broadcast_to(inv_std[:, None], (C, HW)).reshape(1, LANE)
    bias_vals = (-mean.astype(jnp.float32) * inv_std)                      # (C,)
    bias_row = jnp.broadcast_to(bias_vals[:, None], (C, HW)).reshape(1, LANE)
    if pad:
        scale_row = jnp.pad(scale_row, ((0, 0), (0, pad)))
        bias_row = jnp.pad(bias_row, ((0, 0), (0, pad)))
    sb_rows = jnp.concatenate([scale_row, bias_row], axis=0)               # (2, LANE_P)

    # ---- input as a lane-dense (N, LANE_P) slab ----
    x_flat = x.reshape(N, LANE)
    if pad:
        x_flat = jnp.pad(x_flat, ((0, 0), (0, pad)))

    itemsize = jnp.dtype(x.dtype).itemsize
    out_itemsize = jnp.dtype(out_dtype).itemsize

    # ---- batch-row tile: balanced, >=2 steps when possible, VMEM-capped ----
    VMEM_CAP = 48 << 20  # leave headroom under v7x's 64 MiB physical VMEM
    slack = (2 << 20) + 4 * LANE_P * 4  # resident rows (double-buffered) + misc
    per_row_bytes = 2 * LANE_P * (itemsize + out_itemsize)  # in+out, double-buffered
    tb_cap = max(8, ((VMEM_CAP - slack) // per_row_bytes) // 8 * 8)

    if row_block is not None:
        tb = int(row_block)
        if tb >= N:
            tb = N  # full-extent block is always legal
        else:
            tb = max(8, _round_up(tb, 8))  # enforce (8,128) block constraint
    else:
        if N <= 8:
            tb = N
        else:
            # ~512-row targets, but at least 2 near-equal steps so both v7x TCs stream.
            n_steps = max(2, pl.cdiv(N, 512))
            tb = _round_up(pl.cdiv(N, n_steps), 8)
    if tb > tb_cap:
        tb = tb_cap  # multiple of 8, keeps footprint under VMEM_CAP

    grid = (pl.cdiv(N, tb),)

    tile_bytes = tb * LANE_P * (itemsize + out_itemsize)
    needed = 2 * tile_bytes + slack
    vmem_limit = int(min(max(needed, 32 << 20), VMEM_CAP))

    cost = pl.CostEstimate(
        flops=2 * N * LANE,  # one mul + one add per element
        transcendentals=0,
        bytes_accessed=N * LANE * (itemsize + out_itemsize) + 2 * LANE_P * 4,
    )

    can_alias = donate_input and (out_dtype == x.dtype) and (pad == 0)
    io_aliases = {0: 0} if can_alias else {}

    out = pl.pallas_call(
        _normalize_kernel,
        out_shape=jax.ShapeDtypeStruct((N, LANE_P), out_dtype),
        grid_spec=pltpu.PrefetchScalarGridSpec(
            num_scalar_prefetch=0,
            grid=grid,
            in_specs=[
                pl.BlockSpec((tb, LANE_P), lambda i: (i, 0)),
                pl.BlockSpec((2, LANE_P), lambda i: (0, 0)),  # resident across grid
            ],
            out_specs=pl.BlockSpec((tb, LANE_P), lambda i: (i, 0)),
        ),
        compiler_params=pltpu.CompilerParams(
            dimension_semantics=("parallel",),
            vmem_limit_bytes=vmem_limit,
        ),
        cost_estimate=cost,
        input_output_aliases=io_aliases,
    )(x_flat, sb_rows)

    if pad:
        out = out[:, :LANE]
    return out.reshape(N, C, H, W)


if __name__ == "__main__":
    key = jax.random.PRNGKey(0)

    # CIFAR-10 style input: NCHW with 3 channels (the module hard-codes 3).
    N, C, H, W = 2, 3, 32, 32
    x = jax.random.uniform(key, (N, C, H, W), dtype=jnp.float32)

    # Standard CIFAR-10 per-channel statistics.
    mean = jnp.array([0.4914, 0.4822, 0.4465], dtype=jnp.float32)
    std = jnp.array([0.2470, 0.2435, 0.2616], dtype=jnp.float32)

    y = normalize(x, mean, std)
    y = jax.block_until_ready(y)

    # Reference check in plain JAX (same semantics as the PyTorch module).
    ref = (x - mean.reshape(1, 3, 1, 1)) / std.reshape(1, 3, 1, 1)
    assert y.shape == (N, C, H, W)
    assert y.dtype == x.dtype
    assert jnp.allclose(y, ref, rtol=1e-5, atol=1e-5)

    print("KERNEL_OK")
</pallas_src>

<mosaic_0001>
module attributes {stable_mosaic.version = 11 : i64} {
  func.func @_normalize_kernel(%arg0: i32, %arg1: memref<2x3072xf32, #tpu.memory_space<vmem>>, %arg2: memref<2x3072xf32, #tpu.memory_space<vmem>>, %arg3: memref<2x3072xf32, #tpu.memory_space<vmem>>) attributes {dimension_semantics = [#tpu.dimension_semantics<parallel>], iteration_bounds = array<i64: 1>, scalar_prefetch = 0 : i64, scratch_operands = 0 : i64, tpu.core_type = #tpu.core_type<tc>, window_params = [{transform_indices = @transform_0, window_bounds = array<i64: 2, 3072>}, {pipeline_mode = #tpu.pipeline_mode<synchronous>, transform_indices = @transform_1, window_bounds = array<i64: 2, 3072>}, {transform_indices = @transform_2, window_bounds = array<i64: 2, 3072>}]} {
    %c0 = arith.constant 0 : index
    %c0_0 = arith.constant 0 : index
    %0 = vector.load %arg1[%c0, %c0_0] : memref<2x3072xf32, #tpu.memory_space<vmem>>, vector<2x3072xf32>
    %c0_1 = arith.constant 0 : index
    %c0_2 = arith.constant 0 : index
    %1 = vector.load %arg2[%c0_1, %c0_2] : memref<2x3072xf32, #tpu.memory_space<vmem>>, vector<1x3072xf32>
    %c1 = arith.constant 1 : index
    %c0_3 = arith.constant 0 : index
    %2 = vector.load %arg2[%c1, %c0_3] : memref<2x3072xf32, #tpu.memory_space<vmem>>, vector<1x3072xf32>
    %3 = vector.broadcast %1 : vector<1x3072xf32> to vector<2x3072xf32>
    %4 = arith.mulf %0, %3 : vector<2x3072xf32>
    %5 = vector.broadcast %2 : vector<1x3072xf32> to vector<2x3072xf32>
    %6 = arith.addf %4, %5 : vector<2x3072xf32>
    %c0_4 = arith.constant 0 : index
    %c0_5 = arith.constant 0 : index
    %7 = vector.load %arg3[%c0_4, %c0_5] : memref<2x3072xf32, #tpu.memory_space<vmem>>, vector<2x3072xf32>
    tpu.vector_store %arg3[%c0_4, %c0_5], %6 {strides = array<i32>} : memref<2x3072xf32, #tpu.memory_space<vmem>>, vector<2x3072xf32>,
    return
  }
  func.func @transform_0(%arg0: i32) -> (i32, i32) {
    %c0_i32 = arith.constant 0 : i32
    %c0_i32_0 = arith.constant 0 : i32
    return %arg0, %c0_i32 : i32, i32
  }
  func.func @transform_1(%arg0: i32) -> (i32, i32) {
    %c0_i32 = arith.constant 0 : i32
    %c0_i32_0 = arith.constant 0 : i32
    %c0_i32_1 = arith.constant 0 : i32
    return %c0_i32, %c0_i32_0 : i32, i32
  }
  func.func @transform_2(%arg0: i32) -> (i32, i32) {
    %c0_i32 = arith.constant 0 : i32
    %c0_i32_0 = arith.constant 0 : i32
    return %arg0, %c0_i32 : i32, i32
  }
}

</mosaic_0001>

<bundles_post_ra>
// kernel: tpu_custom_call.1
= control target key start
LH: loop header
LB: loop body
LE: loop exit
PB: predicated region body
PF: predicated region fallthrough
CT: control target
= control target key end

     0   :  { %7 = vsyncpa [#allocation3], 0  ;;  %s722_s0 = inlined_call_operand.hbm [shape: f32[2,3072], index: 0, kind: input, shape index: {}]   ;;  %s723_s1 = inlined_call_operand.hbm [shape: f32[2,3072], index: 1, kind: input, shape index: {}]   ;;  %s724_s2 = inlined_call_operand.hbm [shape: f32[2,3072], index: 2, kind: output, shape index: {}]  }
   0x1   :  { %8 = vsyncpa [#allocation6], 0 }
   0x2   :  { %9 = vsyncpa [#allocation4], 0  ;;  %s577_s9 = smov [#allocation2]   ;;  %s578_s11 = smov [#allocation5]  }
   0x3   :  { %s16_s10 = sshll.u32 %s577_s9, 4  ;;  %s26_s12 = sshll.u32 %s578_s11, 4  ;;  %s17_s10 = int_to_ptr.vmem [resolvable:$true] %s16_s10  ;;  %s27_s12 = int_to_ptr.vmem [resolvable:$true] %s26_s12 }
   0x4   :  { %s505_s15 = scalar_lea.hbm %s722_s0, 768 }
   0x5   :  { %p506_p0 = scmp.ne.s32.totalorder %s722_s0, %s505_s15  ;;  %p509_p1 = scmp.lt.u32.totalorder %s505_s15, %s722_s0 }
   0x7   :  { %p511_p2 = pnand %p509_p1, %p506_p0 }
   0x9   :  { %514 = shalt.err (!%p511_p2)
}
   0xa   :  { %s515_s20 = scalar_lea.vmem %s17_s10, 768  ;;  %p520_p4 = scmp.lt.s32.totalorder %s17_s10, %s17_s10 }
   0xb   :  { %p516_p3 = scmp.ne.s32.totalorder %s17_s10, %s515_s20  ;;  %p521_p5 = scmp.lt.s32.totalorder %s515_s20, %s515_s20 }
   0xd   :  { %p522_p6 = por %p521_p5, %p520_p4 }
   0xf   :  { %p523_p7 = pnand %p522_p6, %p516_p3 }
  0x11   :  { %526 = shalt.err (!%p523_p7)
}
  0x12   :  { %19 = dma.hbm_to_vmem [thread:$0]  %s722_s0, 768, %s17_s10, [#allocation3]  }
  0x13   :  { %s527_s25 = scalar_lea.hbm %s723_s1, 768 }
  0x14   :  { %p528_p8 = scmp.ne.s32.totalorder %s723_s1, %s527_s25  ;;  %p531_p9 = scmp.lt.u32.totalorder %s527_s25, %s723_s1 }
  0x16   :  { %p533_p10 = pnand %p531_p9, %p528_p8 }
  0x18   :  { %536 = shalt.err (!%p533_p10)
}
  0x19   :  { %s537_s30 = scalar_lea.vmem %s27_s12, 768  ;;  %p542_p12 = scmp.lt.s32.totalorder %s27_s12, %s27_s12 }
  0x1a   :  { %p538_p11 = scmp.ne.s32.totalorder %s27_s12, %s537_s30  ;;  %p543_p13 = scmp.lt.s32.totalorder %s537_s30, %s537_s30 }
  0x1c   :  { %p544_p0 = por %p543_p13, %p542_p12 }
  0x1e   :  { %p545_p1 = pnand %p544_p0, %p538_p11 }
  0x20   :  { %548 = shalt.err (!%p545_p1)
}
  0x21   :  { %29 = dma.hbm_to_vmem [thread:$0]  %s723_s1, 768, %s27_s12, [#allocation6]  }
  0x22   :  { %571 = dma.done.wait [#allocation3], 768  }
  0x23   :  { %572 = vsyncadd [#allocation3], 4294966528 }
  0x24   :  { %573 = dma.done.wait [#allocation6], 768  }
  0x25   :  { %574 = vsyncadd [#allocation6], 4294966528  ;;  %v56_v0 = vlaneseq  ;;  %v579_v1 = vmov 1983009808   ;;  %v42_v11 = vld [vmem:[#allocation5] ss:$2 sm:$0xff] }
  0x26   :  { %v155_v2 = vunpack.c.l.s4 %v579_v1  ;;  %v48_v12 = vld [vmem:[#allocation5 + $0x1] ss:$2 sm:$0xff]  ;;  %v44_v36 = vld [vmem:[#allocation5 + $0x10] ss:$2 sm:$0xff]  ;;  %v50_v46 = vld [vmem:[#allocation5 + $0x11] ss:$2 sm:$0xff] }
  0x27   :  { %v57_v3 = vshrl.u32 %v56_v0, 7  ;;  %v36_v37 = vld [vmem:[#allocation2] sm:$0xff]  ;;  %v37_v52 = vld [vmem:[#allocation2 + $0x8] sm:$0xff]  ;;  %s580_s1 = smov [#allocation7]  }
  0x28   :  { %v156_v4 = vunpack.c.0.s8 %v155_v2  ;;  %s491_s4 = sshll.u32 %s580_s1, 4  ;;  %s492_s4 = int_to_ptr.vmem [resolvable:$true] %s491_s4 }
  0x29   :  { %v620_v5 = vsub.s32 0, %v57_v3  ;;  %v622_v6 = vsub.s32 1, %v57_v3  ;;  %v624_v7 = vsub.s32 2, %v57_v3  ;;  %v626_v8 = vsub.s32 3, %v57_v3  ;;  %s549_s5 = scalar_lea.vmem %s492_s4, 768  ;;  %p554_p3 = scmp.lt.s32.totalorder %s492_s4, %s492_s4 }
  0x2a   :  { %v628_v9 = vsub.s32 4, %v57_v3  ;;  %v630_v10 = vsub.s32 5, %v57_v3  ;;  %v632_v13 = vsub.s32 %v156_v4, %v57_v3  ;;  %v634_v14 = vsub.s32 6, %v57_v3  ;;  %p550_p2 = scmp.ne.s32.totalorder %s492_s4, %s549_s5  ;;  %p555_p4 = scmp.lt.s32.totalorder %s549_s5, %s549_s5 }
  0x2b   :  { %v636_v15 = vsub.s32 7, %v57_v3  ;;  %v59_v16 = vrot.slane %v42_v11, %v620_v5  ;;  %v63_v17 = vrot.slane %v42_v11, %v622_v6  ;;  %v67_v18 = vrot.slane %v42_v11, %v624_v7 }
  0x2c   :  { %v71_v19 = vrot.slane %v42_v11, %v626_v8  ;;  %v272_v20 = vrot.slane %v48_v12, %v620_v5  ;;  %v276_v21 = vrot.slane %v48_v12, %v622_v6  ;;  %v280_v22 = vrot.slane %v48_v12, %v624_v7  ;;  %p556_p5 = por %p555_p4, %p554_p3 }
  0x2d   :  { %v284_v23 = vrot.slane %v48_v12, %v626_v8  ;;  %v152_v24 = vcombine.low %v59_v16, %v63_v17  ;;  %v75_v26 = vrot.slane %v42_v11, %v628_v9  ;;  %v79_v27 = vrot.slane %v42_v11, %v630_v10 }
  0x2e   :  { %v153_v25 = vcombine.low %v67_v18, %v71_v19  ;;  %v365_v28 = vcombine.low %v272_v20, %v276_v21  ;;  %v83_v30 = vrot.slane %v42_v11, %v634_v14  ;;  %v87_v31 = vrot.slane %v42_v11, %v636_v15  ;;  %v46_v21 = vld [vmem:[#allocation5 + $0x20] ss:$2 sm:$0xff]  ;;  %p557_p6 = pnand %p556_p5, %p550_p2 }
  0x2f   :  { %v366_v29 = vcombine.low %v280_v22, %v284_v23  ;;  %v160_v32 = vrot.slane %v152_v24, %v632_v13  ;;  %v169_v34 = vcombine.low %v75_v26, %v79_v27  ;;  %v288_v35 = vrot.slane %v48_v12, %v628_v9  ;;  %v38_v23 = vld [vmem:[#allocation2 + $0x10] sm:$0xff] }
  0x30   :  { %v167_v33 = vrot.slane %v153_v25, %v632_v13  ;;  %v373_v38 = vrot.slane %v365_v28, %v632_v13  ;;  %v170_v40 = vcombine.low %v83_v30, %v87_v31  ;;  %v292_v41 = vrot.slane %v48_v12, %v630_v10 }
  0x31   :  { %v380_v39 = vrot.slane %v366_v29, %v632_v13  ;;  %v177_v43 = vrot.slane %v169_v34, %v632_v13  ;;  %v296_v44 = vrot.slane %v48_v12, %v634_v14  ;;  %v300_v45 = vrot.slane %v48_v12, %v636_v15  ;;  %v52_v34 = vld [vmem:[#allocation5 + $0x21] ss:$2 sm:$0xff] }
  0x32   :  { %v168_v42 = vcombine.low %v160_v32, %v167_v33  ;;  %v184_v48 = vrot.slane %v170_v40, %v632_v13  ;;  %v382_v49 = vcombine.low %v288_v35, %v292_v41  ;;  %v91_v50 = vrot.slane %v44_v36, %v620_v5 }
  0x33   :  { %v381_v47 = vcombine.low %v373_v38, %v380_v39  ;;  %v383_v53 = vcombine.low %v296_v44, %v300_v45  ;;  %v95_v54 = vrot.slane %v44_v36, %v622_v6  ;;  %v99_v55 = vrot.slane %v44_v36, %v624_v7  ;;  %v39_v45 = vld [vmem:[#allocation2 + $0x18] sm:$0xff] }
  0x34   :  { %v260_v51 = vmul.f32 %v168_v42, %v36_v37  ;;  %v185_v56 = vcombine.low %v177_v43, %v184_v48  ;;  %v390_v57 = vrot.slane %v382_v49, %v632_v13  ;;  %v103_v58 = vrot.slane %v44_v36, %v626_v8 }
  0x35   :  { %v304_v59 = vrot.slane %v50_v46, %v620_v5  ;;  %v397_v61 = vrot.slane %v383_v53, %v632_v13  ;;  %v186_v62 = vcombine.low %v91_v50, %v95_v54  ;;  %v308_v63 = vrot.slane %v50_v46, %v622_v6 }
  0x36   :  { %v473_v60 = vadd.f32 %v381_v47, %v260_v51  ;;  %v261_v0 = vmul.f32 %v185_v56, %v37_v52  ;;  %v187_v1 = vcombine.low %v99_v55, %v103_v58  ;;  %v312_v2 = vrot.slane %v50_v46, %v624_v7 }
  0x37   :  { %v316_v3 = vrot.slane %v50_v46, %v626_v8  ;;  %v398_v4 = vcombine.low %v390_v57, %v397_v61  ;;  %v194_v11 = vrot.slane %v186_v62, %v632_v13  ;;  %v399_v12 = vcombine.low %v304_v59, %v308_v63 }
  0x38   :  { %479 = vst [vmem:[#allocation7] sm:$0xff] %v473_v60  ;;  %v107_v16 = vrot.slane %v44_v36, %v628_v9  ;;  %v201_v17 = vrot.slane %v187_v1, %v632_v13  ;;  %v111_v19 = vrot.slane %v44_v36, %v630_v10  ;;  %v115_v20 = vrot.slane %v44_v36, %v634_v14 }
  0x39   :  { %v400_v18 = vcombine.low %v312_v2, %v316_v3  ;;  %v474_v22 = vadd.f32 %v398_v4, %v261_v0  ;;  %v407_v24 = vrot.slane %v399_v12, %v632_v13  ;;  %v119_v25 = vrot.slane %v44_v36, %v636_v15  ;;  %v40_v0 = vld [vmem:[#allocation2 + $0x20] sm:$0xff] }
  0x3a   :  { %v320_v26 = vrot.slane %v50_v46, %v628_v9  ;;  %v202_v27 = vcombine.low %v194_v11, %v201_v17  ;;  %v203_v29 = vcombine.low %v107_v16, %v111_v19  ;;  %v324_v30 = vrot.slane %v50_v46, %v630_v10 }
  0x3b   :  { %v414_v28 = vrot.slane %v400_v18, %v632_v13  ;;  %480 = vst [vmem:[#allocation7 + $0x8] sm:$0xff] %v474_v22  ;;  %v204_v31 = vcombine.low %v115_v20, %v119_v25  ;;  %v328_v32 = vrot.slane %v50_v46, %v634_v14  ;;  %v332_v33 = vrot.slane %v50_v46, %v636_v15 }
  0x3c   :  { %v123_v35 = vrot.slane %v46_v21, %v620_v5  ;;  %v262_v37 = vmul.f32 %v202_v27, %v38_v23  ;;  %v211_v36 = vrot.slane %v203_v29, %v632_v13  ;;  %v416_v39 = vcombine.low %v320_v26, %v324_v30 }
  0x3d   :  { %v415_v38 = vcombine.low %v407_v24, %v414_v28  ;;  %v218_v40 = vrot.slane %v204_v31, %v632_v13  ;;  %v417_v41 = vcombine.low %v328_v32, %v332_v33  ;;  %v127_v42 = vrot.slane %v46_v21, %v622_v6  ;;  %v41_v24 = vld [vmem:[#allocation2 + $0x28] sm:$0xff] }
  0x3e   :  { %v131_v43 = vrot.slane %v46_v21, %v624_v7  ;;  %v424_v47 = vrot.slane %v416_v39, %v632_v13  ;;  %v135_v46 = vrot.slane %v46_v21, %v626_v8  ;;  %v336_v48 = vrot.slane %v52_v34, %v620_v5 }
  0x3f   :  { %v475_v44 = vadd.f32 %v415_v38, %v262_v37  ;;  %v219_v49 = vcombine.low %v211_v36, %v218_v40  ;;  %v431_v50 = vrot.slane %v417_v41, %v632_v13  ;;  %v220_v51 = vcombine.low %v123_v35, %v127_v42 }
  0x40   :  { %v340_v52 = vrot.slane %v52_v34, %v622_v6  ;;  %v221_v53 = vcombine.low %v131_v43, %v135_v46  ;;  %v344_v54 = vrot.slane %v52_v34, %v624_v7  ;;  %v348_v55 = vrot.slane %v52_v34, %v626_v8 }
  0x41   :  { %481 = vst [vmem:[#allocation7 + $0x10] sm:$0xff] %v475_v44  ;;  %v139_v56 = vrot.slane %v46_v21, %v628_v9  ;;  %v263_v57 = vmul.f32 %v219_v49, %v39_v45  ;;  %v432_v58 = vcombine.low %v424_v47, %v431_v50  ;;  %v228_v59 = vrot.slane %v220_v51, %v632_v13 }
  0x42   :  { %v433_v60 = vcombine.low %v336_v48, %v340_v52  ;;  %v235_v5 = vrot.slane %v221_v53, %v632_v13  ;;  %v434_v61 = vcombine.low %v344_v54, %v348_v55  ;;  %v143_v62 = vrot.slane %v46_v21, %v630_v10 }
  0x43   :  { %v147_v6 = vrot.slane %v46_v21, %v634_v14  ;;  %v476_v63 = vadd.f32 %v432_v58, %v263_v57  ;;  %v151_v8 = vrot.slane %v46_v21, %v636_v15  ;;  %v352_v1 = vrot.slane %v52_v34, %v628_v9 }
  0x44   :  { %v441_v7 = vrot.slane %v433_v60, %v632_v13  ;;  %v236_v2 = vcombine.low %v228_v59, %v235_v5  ;;  %v448_v3 = vrot.slane %v434_v61, %v632_v13  ;;  %v237_v4 = vcombine.low %v139_v56, %v143_v62 }
  0x45   :  { %v356_v11 = vrot.slane %v52_v34, %v630_v10  ;;  %482 = vst [vmem:[#allocation7 + $0x18] sm:$0xff] %v476_v63  ;;  %v238_v12 = vcombine.low %v147_v6, %v151_v8  ;;  %v360_v16 = vrot.slane %v52_v34, %v634_v14  ;;  %v364_v17 = vrot.slane %v52_v34, %v636_v15 }
  0x46   :  { %v264_v18 = vmul.f32 %v236_v2, %v40_v0  ;;  %v449_v19 = vcombine.low %v441_v7, %v448_v3  ;;  %v245_v20 = vrot.slane %v237_v4, %v632_v13 }
  0x47   :  { %v450_v22 = vcombine.low %v352_v1, %v356_v11  ;;  %v252_v21 = vrot.slane %v238_v12, %v632_v13  ;;  %v451_v9 = vcombine.low %v360_v16, %v364_v17 }
  0x48   :  { %v477_v23 = vadd.f32 %v449_v19, %v264_v18 }
  0x49   :  { %v458_v25 = vrot.slane %v450_v22, %v632_v13  ;;  %v253_v26 = vcombine.low %v245_v20, %v252_v21  ;;  %v465_v10 = vrot.slane %v451_v9, %v632_v13 }
  0x4a   :  { %483 = vst [vmem:[#allocation7 + $0x20] sm:$0xff] %v477_v23 }
  0x4b   :  { %v265_v14 = vmul.f32 %v253_v26, %v41_v24  ;;  %v466_v15 = vcombine.low %v458_v25, %v465_v10 }
  0x4d   :  { %v478_v27 = vadd.f32 %v466_v15, %v265_v14 }
  0x4f   :  { %484 = vst [vmem:[#allocation7 + $0x28] sm:$0xff] %v478_v27 }
  0x50   :  { %560 = shalt.err (!%p557_p6)
}
  0x51   :  { %s561_s8 = scalar_lea.hbm %s724_s2, 768 }
  0x52   :  { %p562_p7 = scmp.ne.s32.totalorder %s724_s2, %s561_s8  ;;  %p565_p8 = scmp.lt.u32.totalorder %s561_s8, %s724_s2 }
  0x54   :  { %p567_p9 = pnand %p565_p8, %p562_p7 }
  0x56   :  { %570 = shalt.err (!%p567_p9)
}
  0x57   :  { %494 = dma.vmem_to_hbm [thread:$0]  %s492_s4, 768, %s724_s2, [#allocation4]  }
  0x58   :  { %575 = dma.done.wait [#allocation4], 768  }
  0x59   :  { %576 = vsyncadd [#allocation4], 4294966528 }
  0x5a   :  { %498 = vsyncpa [#allocation3], 1 }
  0x5b   :  { %499 = vsyncpa [#allocation6], 1 }
  0x5c   :  { %500 = vsyncpa [#allocation4], 1 }

</bundles_post_ra>
